<compile_context>
chip_gen: v5e
topology: v5e:2x2
jax: 0.10.0
libtpu: 0.0.40
codegen_flags: <defaults>
</compile_context>

<pallas_src>
import functools

import jax
import jax.numpy as jnp
from jax import lax
from jax.experimental import pallas as pl
from jax.experimental.pallas import tpu as pltpu

ENCODER_VTH = 1.0


def _pop_spike_kernel(obs_ref, mean_ref, coef_ref, out_ref, *, chunk):
    """One batch tile.

    obs_ref : (tb, N_pad)     f32, obs pre-broadcast across pop_dim, zero pad lanes
    mean_ref: (1, N_pad)      f32, flattened means (pad lanes: huge value)
    coef_ref: (1, N_pad)      f32, -0.5/std^2       (pad lanes: -1.0 -> pop_act==0)
    out_ref : (T, tb, N_pad)  spikes; time-leading so each store is a lane-dense
                              (chunk, N_pad) slab (unmasked when chunk % 8 == 0)
    """
    n_steps = out_ref.shape[0]          # static spike_ts
    tb = out_ref.shape[1]
    n_chunks = tb // chunk              # static; wrapper guarantees divisibility

    mean = mean_ref[...]                # (1, N_pad), sublane-broadcasts below
    coef = coef_ref[...]

    def chunk_body(c, carry):
        r0 = pl.multiple_of(c * chunk, chunk)
        diff = obs_ref[pl.ds(r0, chunk), :] - mean              # (chunk, N_pad)
        pop_act = jnp.exp(diff * diff * coef)                   # Gaussian RF (EUP)
        volt = jnp.zeros_like(pop_act)                          # stays in vregs
        # static unroll over the small compile-time spike_ts
        # (for spike_ts >> 16 switch this to a lax.fori_loop with volt as carry)
        for t in range(n_steps):
            volt = volt + pop_act
            spike = volt > ENCODER_VTH
            out_ref[t, pl.ds(r0, chunk), :] = spike.astype(out_ref.dtype)
            volt = jnp.where(spike, volt - ENCODER_VTH, volt)   # VTH == 1.0
        return carry

    lax.fori_loop(0, n_chunks, chunk_body, 0)


def _choose_tiles(B, spike_ts, n_pad, out_bytes, max_tile):
    """Pick (batch_tile, row_chunk).

    The double-buffered (spike_ts, tb, N_pad) output block dominates VMEM; budget
    it at 12 MiB so it fits the smallest default scoped VMEM (v5e: 16 MiB) without
    needing vmem_limit_bytes overrides. Keep tb a multiple of 8 and, for large
    batches, >= 2 grid blocks so v7x megacore can shard the "parallel" axis.
    """
    if B <= 8:
        return B, B                                   # tiny batch: one chunk
    budget = 12 << 20
    bytes_per_row = 2 * spike_ts * n_pad * out_bytes + 2 * n_pad * 4
    tb = max(8, budget // bytes_per_row)
    if B >= 256:
        tb = min(tb, pl.cdiv(B, 2))                   # >= 2 blocks for megacore
    tb = int(min(tb, max_tile, B))
    tb = max(8, (tb // 8) * 8)                        # sublane-aligned tile
    chunk = 32 if tb % 32 == 0 else 8                 # rows kept in vregs over T
    return tb, chunk


def pop_spike_encoder_deterministic(obs, mean, std, spike_ts, *,
                                    out_dtype=jnp.float32,
                                    time_major=False,
                                    max_batch_tile=2048):
    """obs: (B, obs_dim) f32; mean/std: (1, obs_dim, pop_dim) f32.

    Returns pop_spikes:
      (B, obs_dim*pop_dim, spike_ts)   if time_major=False  (PyTorch layout)
      (B, spike_ts, obs_dim*pop_dim)   if time_major=True   (skips the transpose)
    """
    obs = obs.astype(jnp.float32)
    B, obs_dim = obs.shape
    pop_dim = mean.shape[-1]
    N = obs_dim * pop_dim
    n_pad = ((N + 127) // 128) * 128
    pad = n_pad - N

    # Flattened, lane-dense parameters. Pad lanes are set so pop_act == 0 there:
    # diff is huge (finite) and coef negative -> exp(very negative) == 0.
    mean_flat = mean.reshape(N).astype(jnp.float32)
    coef_flat = -0.5 / (std.astype(jnp.float32).reshape(N) ** 2)
    if pad:
        mean_flat = jnp.concatenate(
            [mean_flat, jnp.full((pad,), 3e18, jnp.float32)])
        coef_flat = jnp.concatenate(
            [coef_flat, jnp.full((pad,), -1.0, jnp.float32)])
    mean_flat = mean_flat.reshape(1, n_pad)
    coef_flat = coef_flat.reshape(1, n_pad)

    # obs broadcast across pop_dim, zero-padded to the lane-aligned width.
    obs_rep = jnp.broadcast_to(obs[:, :, None],
                               (B, obs_dim, pop_dim)).reshape(B, N)
    if pad:
        obs_rep = jnp.pad(obs_rep, ((0, 0), (0, pad)))

    out_bytes = jnp.dtype(out_dtype).itemsize
    tb, chunk = _choose_tiles(B, spike_ts, n_pad, out_bytes, max_batch_tile)
    grid = (pl.cdiv(B, tb),)

    kernel = functools.partial(_pop_spike_kernel, chunk=chunk)

    out = pl.pallas_call(
        kernel,
        out_shape=jax.ShapeDtypeStruct((spike_ts, B, n_pad), out_dtype),
        grid_spec=pltpu.PrefetchScalarGridSpec(
            num_scalar_prefetch=0,
            grid=grid,
            in_specs=[
                pl.BlockSpec((tb, n_pad), lambda i: (i, 0)),      # obs tile
                pl.BlockSpec((1, n_pad), lambda i: (0, 0)),       # mean (shared)
                pl.BlockSpec((1, n_pad), lambda i: (0, 0)),       # coef (shared)
            ],
            out_specs=pl.BlockSpec((spike_ts, tb, n_pad),
                                   lambda i: (0, i, 0)),           # time-leading
        ),
        compiler_params=pltpu.CompilerParams(
            dimension_semantics=("parallel",)),                    # megacore on v7x
    )(obs_rep, mean_flat, coef_flat)

    out = out[:, :, :N]                                            # drop pad lanes
    if time_major:
        return jnp.transpose(out, (1, 0, 2))      # (B, T, N), no extra HBM pass
    # PyTorch layout (B, N, T); single transpose — set time_major=True if the
    # consumer can absorb the time-major layout instead.
    return jnp.transpose(out, (1, 2, 0))


def _reference(obs, mean, std, spike_ts):
    """Pure-JAX reference mirroring the PyTorch forward (same math as kernel)."""
    B, obs_dim = obs.shape
    pop_dim = mean.shape[-1]
    coef = -0.5 / (std.astype(jnp.float32) ** 2)
    diff = obs[:, :, None] - mean
    pop_act = jnp.exp(diff * diff * coef).reshape(B, obs_dim * pop_dim)
    volt = jnp.zeros((B, obs_dim * pop_dim), jnp.float32)
    spikes = []
    for _ in range(spike_ts):
        volt = volt + pop_act
        s = (volt > ENCODER_VTH).astype(jnp.float32)
        spikes.append(s)
        volt = volt - s * ENCODER_VTH
    return jnp.stack(spikes, axis=-1)


if __name__ == "__main__":
    def run_case(batch, obs_dim, pop_dim, spike_ts, key):
        # deterministic parameter init, matching the torch __init__
        mean_range = (-1.0, 1.0)
        std_val = 0.5
        delta_mean = (mean_range[1] - mean_range[0]) / (pop_dim - 1)
        mean = mean_range[0] + delta_mean * jnp.arange(pop_dim, dtype=jnp.float32)
        mean = jnp.broadcast_to(mean[None, None, :], (1, obs_dim, pop_dim))
        std = jnp.full((1, obs_dim, pop_dim), std_val, dtype=jnp.float32)
        obs = jax.random.normal(key, (batch, obs_dim), dtype=jnp.float32)

        out = pop_spike_encoder_deterministic(obs, mean, std, spike_ts)
        out = jax.block_until_ready(out)
        ref = _reference(obs, mean, std, spike_ts)
        assert out.shape == (batch, obs_dim * pop_dim, spike_ts)
        assert jnp.allclose(out, ref, atol=1e-6), "mismatch vs reference"

        out_tm = pop_spike_encoder_deterministic(obs, mean, std, spike_ts,
                                                 time_major=True)
        out_tm = jax.block_until_ready(out_tm)
        assert jnp.allclose(jnp.transpose(out_tm, (0, 2, 1)), ref, atol=1e-6)

    key = jax.random.PRNGKey(0)
    k1, k2 = jax.random.split(key)
    # module-sized case (matches the torch hyper-parameters)
    run_case(batch=2, obs_dim=4, pop_dim=10, spike_ts=5, key=k1)
    # larger case exercising lane padding (N=130 -> 256) and the chunked row loop
    run_case(batch=16, obs_dim=13, pop_dim=10, spike_ts=5, key=k2)

    print("KERNEL_OK")
</pallas_src>

<mosaic_0001>
module attributes {stable_mosaic.version = 11 : i64} {
  func.func @_pop_spike_kernel(%arg0: i32, %arg1: memref<2x128xf32, #tpu.memory_space<vmem>>, %arg2: memref<1x128xf32, #tpu.memory_space<vmem>>, %arg3: memref<1x128xf32, #tpu.memory_space<vmem>>, %arg4: memref<5x2x128xf32, #tpu.memory_space<vmem>>) attributes {dimension_semantics = [#tpu.dimension_semantics<parallel>], iteration_bounds = array<i64: 1>, scalar_prefetch = 0 : i64, scratch_operands = 0 : i64, tpu.core_type = #tpu.core_type<tc>, window_params = [{transform_indices = @transform_0, window_bounds = array<i64: 2, 128>}, {pipeline_mode = #tpu.pipeline_mode<synchronous>, transform_indices = @transform_1, window_bounds = array<i64: 1, 128>}, {pipeline_mode = #tpu.pipeline_mode<synchronous>, transform_indices = @transform_2, window_bounds = array<i64: 1, 128>}, {transform_indices = @transform_3, window_bounds = array<i64: 5, 2, 128>}]} {
    %c0 = arith.constant 0 : index
    %c0_0 = arith.constant 0 : index
    %0 = vector.load %arg2[%c0, %c0_0] : memref<1x128xf32, #tpu.memory_space<vmem>>, vector<1x128xf32>
    %c0_1 = arith.constant 0 : index
    %c0_2 = arith.constant 0 : index
    %1 = vector.load %arg3[%c0_1, %c0_2] : memref<1x128xf32, #tpu.memory_space<vmem>>, vector<1x128xf32>
    %c0_i32 = arith.constant 0 : i32
    %c2_i32 = arith.constant 2 : i32
    %2 = arith.muli %c0_i32, %c2_i32 : i32
    %3 = tpu.assume_multiple %2, 2 : i32
    %4 = arith.index_cast %3 : i32 to index
    %c0_3 = arith.constant 0 : index
    %5 = vector.load %arg1[%4, %c0_3] : memref<2x128xf32, #tpu.memory_space<vmem>>, vector<2x128xf32>
    %6 = vector.broadcast %0 : vector<1x128xf32> to vector<2x128xf32>
    %7 = arith.subf %5, %6 : vector<2x128xf32>
    %8 = arith.mulf %7, %7 : vector<2x128xf32>
    %9 = vector.broadcast %1 : vector<1x128xf32> to vector<2x128xf32>
    %10 = arith.mulf %8, %9 : vector<2x128xf32>
    %11 = math.exp %10 : vector<2x128xf32>
    %cst = arith.constant 0.000000e+00 : f32
    %12 = vector.broadcast %cst : f32 to vector<2x128xf32>
    %13 = arith.addf %12, %11 : vector<2x128xf32>
    %cst_4 = arith.constant 1.000000e+00 : f32
    %14 = vector.broadcast %cst_4 : f32 to vector<2x128xf32>
    %15 = arith.cmpf ogt, %13, %14 : vector<2x128xf32>
    %16 = arith.extui %15 : vector<2x128xi1> to vector<2x128xi32>
    %17 = arith.sitofp %16 : vector<2x128xi32> to vector<2x128xf32>
    %c0_5 = arith.constant 0 : index
    %18 = arith.index_cast %3 : i32 to index
    %c0_6 = arith.constant 0 : index
    %19 = vector.load %arg4[%c0_5, %18, %c0_6] : memref<5x2x128xf32, #tpu.memory_space<vmem>>, vector<1x2x128xf32>
    %20 = vector.shape_cast %19 : vector<1x2x128xf32> to vector<2x128xf32>
    %21 = vector.shape_cast %17 : vector<2x128xf32> to vector<1x2x128xf32>
    tpu.vector_store %arg4[%c0_5, %18, %c0_6], %21 {strides = array<i32>} : memref<5x2x128xf32, #tpu.memory_space<vmem>>, vector<1x2x128xf32>,
    %cst_7 = arith.constant 1.000000e+00 : f32
    %22 = vector.broadcast %cst_7 : f32 to vector<2x128xf32>
    %23 = arith.subf %13, %22 : vector<2x128xf32>
    %24 = arith.select %15, %23, %13 : vector<2x128xi1>, vector<2x128xf32>
    %25 = arith.addf %24, %11 : vector<2x128xf32>
    %cst_8 = arith.constant 1.000000e+00 : f32
    %26 = vector.broadcast %cst_8 : f32 to vector<2x128xf32>
    %27 = arith.cmpf ogt, %25, %26 : vector<2x128xf32>
    %28 = arith.extui %27 : vector<2x128xi1> to vector<2x128xi32>
    %29 = arith.sitofp %28 : vector<2x128xi32> to vector<2x128xf32>
    %c1 = arith.constant 1 : index
    %30 = arith.index_cast %3 : i32 to index
    %c0_9 = arith.constant 0 : index
    %31 = vector.load %arg4[%c1, %30, %c0_9] : memref<5x2x128xf32, #tpu.memory_space<vmem>>, vector<1x2x128xf32>
    %32 = vector.shape_cast %31 : vector<1x2x128xf32> to vector<2x128xf32>
    %33 = vector.shape_cast %29 : vector<2x128xf32> to vector<1x2x128xf32>
    tpu.vector_store %arg4[%c1, %30, %c0_9], %33 {strides = array<i32>} : memref<5x2x128xf32, #tpu.memory_space<vmem>>, vector<1x2x128xf32>,
    %cst_10 = arith.constant 1.000000e+00 : f32
    %34 = vector.broadcast %cst_10 : f32 to vector<2x128xf32>
    %35 = arith.subf %25, %34 : vector<2x128xf32>
    %36 = arith.select %27, %35, %25 : vector<2x128xi1>, vector<2x128xf32>
    %37 = arith.addf %36, %11 : vector<2x128xf32>
    %cst_11 = arith.constant 1.000000e+00 : f32
    %38 = vector.broadcast %cst_11 : f32 to vector<2x128xf32>
    %39 = arith.cmpf ogt, %37, %38 : vector<2x128xf32>
    %40 = arith.extui %39 : vector<2x128xi1> to vector<2x128xi32>
    %41 = arith.sitofp %40 : vector<2x128xi32> to vector<2x128xf32>
    %c2 = arith.constant 2 : index
    %42 = arith.index_cast %3 : i32 to index
    %c0_12 = arith.constant 0 : index
    %43 = vector.load %arg4[%c2, %42, %c0_12] : memref<5x2x128xf32, #tpu.memory_space<vmem>>, vector<1x2x128xf32>
    %44 = vector.shape_cast %43 : vector<1x2x128xf32> to vector<2x128xf32>
    %45 = vector.shape_cast %41 : vector<2x128xf32> to vector<1x2x128xf32>
    tpu.vector_store %arg4[%c2, %42, %c0_12], %45 {strides = array<i32>} : memref<5x2x128xf32, #tpu.memory_space<vmem>>, vector<1x2x128xf32>,
    %cst_13 = arith.constant 1.000000e+00 : f32
    %46 = vector.broadcast %cst_13 : f32 to vector<2x128xf32>
    %47 = arith.subf %37, %46 : vector<2x128xf32>
    %48 = arith.select %39, %47, %37 : vector<2x128xi1>, vector<2x128xf32>
    %49 = arith.addf %48, %11 : vector<2x128xf32>
    %cst_14 = arith.constant 1.000000e+00 : f32
    %50 = vector.broadcast %cst_14 : f32 to vector<2x128xf32>
    %51 = arith.cmpf ogt, %49, %50 : vector<2x128xf32>
    %52 = arith.extui %51 : vector<2x128xi1> to vector<2x128xi32>
    %53 = arith.sitofp %52 : vector<2x128xi32> to vector<2x128xf32>
    %c3 = arith.constant 3 : index
    %54 = arith.index_cast %3 : i32 to index
    %c0_15 = arith.constant 0 : index
    %55 = vector.load %arg4[%c3, %54, %c0_15] : memref<5x2x128xf32, #tpu.memory_space<vmem>>, vector<1x2x128xf32>
    %56 = vector.shape_cast %55 : vector<1x2x128xf32> to vector<2x128xf32>
    %57 = vector.shape_cast %53 : vector<2x128xf32> to vector<1x2x128xf32>
    tpu.vector_store %arg4[%c3, %54, %c0_15], %57 {strides = array<i32>} : memref<5x2x128xf32, #tpu.memory_space<vmem>>, vector<1x2x128xf32>,
    %cst_16 = arith.constant 1.000000e+00 : f32
    %58 = vector.broadcast %cst_16 : f32 to vector<2x128xf32>
    %59 = arith.subf %49, %58 : vector<2x128xf32>
    %60 = arith.select %51, %59, %49 : vector<2x128xi1>, vector<2x128xf32>
    %61 = arith.addf %60, %11 : vector<2x128xf32>
    %cst_17 = arith.constant 1.000000e+00 : f32
    %62 = vector.broadcast %cst_17 : f32 to vector<2x128xf32>
    %63 = arith.cmpf ogt, %61, %62 : vector<2x128xf32>
    %64 = arith.extui %63 : vector<2x128xi1> to vector<2x128xi32>
    %65 = arith.sitofp %64 : vector<2x128xi32> to vector<2x128xf32>
    %c4 = arith.constant 4 : index
    %66 = arith.index_cast %3 : i32 to index
    %c0_18 = arith.constant 0 : index
    %67 = vector.load %arg4[%c4, %66, %c0_18] : memref<5x2x128xf32, #tpu.memory_space<vmem>>, vector<1x2x128xf32>
    %68 = vector.shape_cast %67 : vector<1x2x128xf32> to vector<2x128xf32>
    %69 = vector.shape_cast %65 : vector<2x128xf32> to vector<1x2x128xf32>
    tpu.vector_store %arg4[%c4, %66, %c0_18], %69 {strides = array<i32>} : memref<5x2x128xf32, #tpu.memory_space<vmem>>, vector<1x2x128xf32>,
    %c1_i32 = arith.constant 1 : i32
    return
  }
  func.func @transform_0(%arg0: i32) -> (i32, i32) {
    %c0_i32 = arith.constant 0 : i32
    %c0_i32_0 = arith.constant 0 : i32
    return %arg0, %c0_i32 : i32, i32
  }
  func.func @transform_1(%arg0: i32) -> (i32, i32) {
    %c0_i32 = arith.constant 0 : i32
    %c0_i32_0 = arith.constant 0 : i32
    %c0_i32_1 = arith.constant 0 : i32
    return %c0_i32, %c0_i32_0 : i32, i32
  }
  func.func @transform_2(%arg0: i32) -> (i32, i32) {
    %c0_i32 = arith.constant 0 : i32
    %c0_i32_0 = arith.constant 0 : i32
    %c0_i32_1 = arith.constant 0 : i32
    return %c0_i32, %c0_i32_0 : i32, i32
  }
  func.func @transform_3(%arg0: i32) -> (i32, i32, i32) {
    %c0_i32 = arith.constant 0 : i32
    %c0_i32_0 = arith.constant 0 : i32
    %c0_i32_1 = arith.constant 0 : i32
    return %c0_i32, %arg0, %c0_i32_0 : i32, i32, i32
  }
}

</mosaic_0001>

<bundles_post_ra>
// kernel: tpu_custom_call.1
= control target key start
LH: loop header
LB: loop body
LE: loop exit
PB: predicated region body
PF: predicated region fallthrough
CT: control target
= control target key end

     0   :  { %8 = vsyncpa [#allocation3], 0  ;;  %s257_s0 = inlined_call_operand.hbm [shape: f32[2,128], index: 0, kind: input, shape index: {}]   ;;  %s258_s1 = inlined_call_operand.hbm [shape: f32[1,128], index: 1, kind: input, shape index: {}]   ;;  %s259_s2 = inlined_call_operand.vmem [shape: f32[1,128], index: 2, kind: input, shape index: {}]   ;;  %s260_s3 = inlined_call_operand.hbm [shape: f32[5,2,128], index: 3, kind: output, shape index: {}]  }
   0x1   :  { %9 = vsyncpa [#allocation6], 0 }
   0x2   :  { %10 = vsyncpa [#allocation4], 0  ;;  %s16_s14 = sshll.u32 %s257_s0, 4  ;;  %s219_s15 = smov [#allocation2]   ;;  %s17_s14 = int_to_ptr.hbm [resolvable:$true] %s16_s14 }
   0x3   :  { %s18_s16 = sshll.u32 %s219_s15, 4  ;;  %s27_s19 = sshll.u32 %s258_s1, 4  ;;  %s19_s16 = int_to_ptr.vmem [resolvable:$true] %s18_s16  ;;  %s28_s19 = int_to_ptr.hbm [resolvable:$true] %s27_s19 }
   0x4   :  { %21 = dma.hbm_to_vmem [thread:$0]  %s17_s14, 32, %s19_s16, [#allocation3]  }
   0x5   :  { %s220_s20 = smov [#allocation5]  }
   0x6   :  { %s29_s21 = sshll.u32 %s220_s20, 4  ;;  %s30_s21 = int_to_ptr.vmem [resolvable:$true] %s29_s21 }
   0x7   :  { %32 = dma.hbm_to_vmem [thread:$0]  %s28_s19, 16, %s30_s21, [#allocation6]  }
   0x8   :  { %213 = dma.done.wait [#allocation3], 32  }
   0x9   :  { %214 = vsyncadd [#allocation3], 4294967264 }
   0xa   :  { %215 = dma.done.wait [#allocation6], 16  }
   0xb   :  { %216 = vsyncadd [#allocation6], 4294967280  ;;  %v45_v0 = vld [vmem:[#allocation2] sm:$0x3]  ;;  %v137_v1 = vld [vmem:[#allocation5] ss:$0 sm:$0xff] }
   0xc   :  { %v49_v2 = vsub.f32 %v45_v0, %v137_v1  ;;  %v138_v3 = vld [vmem:[%s259_s2] ss:$0 sm:$0xff]  ;;  %v221_v9 = vmov 0.0   ;;  %s222_s1 = smov [#allocation7]   ;;  %s104_s25 = sshll.u32 %s260_s3, 4  ;;  %s105_s25 = int_to_ptr.hbm [resolvable:$true] %s104_s25 }
   0xd   :  { %s102_s2 = sshll.u32 %s222_s1, 4  ;;  %s223_s26 = smov 32   ;;  %s103_s2 = int_to_ptr.vmem [resolvable:$true] %s102_s2 }
   0xe   :  { %v50_v4 = vmul.f32 %v49_v2, %v49_v2  ;;  %s224_s27 = smov 2  }
  0x10   :  { %v54_v5 = vmul.f32 %v138_v3, %v50_v4 }
  0x12   :  { %v55_v6 = vmul.f32 1.442695, %v54_v5 }
  0x14   :  { %139 = vpow2.f32 %v55_v6 }
  0x1a   :  { %v140_v7 = vpop.eup %139 }
  0x1b   :  { %vm58_vm0 = vcmp.gt.f32.partialorder %v140_v7, 1.0  ;;  %v123_v8 = vadd.f32 -1.0, %v140_v7 }
  0x1c   :  { %v122_v10 = vsel %vm58_vm0, 1.0, %v221_v9 }
  0x1d   :  { %61 = vst [vmem:[#allocation7] sm:$0x3] %v122_v10  ;;  %v63_v11 = vsel %vm58_vm0, %v123_v8, %v140_v7 }
  0x1e   :  { %v64_v12 = vadd.f32 %v140_v7, %v63_v11 }
  0x20   :  { %vm65_vm1 = vcmp.gt.f32.partialorder %v64_v12, 1.0  ;;  %v125_v13 = vadd.f32 -1.0, %v64_v12 }
  0x21   :  { %v124_v14 = vsel %vm65_vm1, 1.0, %v221_v9 }
  0x22   :  { %70 = vst [vmem:[#allocation7 + $0x2] sm:$0x3] %v124_v14  ;;  %v72_v15 = vsel %vm65_vm1, %v125_v13, %v64_v12 }
  0x23   :  { %v73_v16 = vadd.f32 %v140_v7, %v72_v15 }
  0x25   :  { %vm74_vm2 = vcmp.gt.f32.partialorder %v73_v16, 1.0  ;;  %v127_v17 = vadd.f32 -1.0, %v73_v16 }
  0x26   :  { %v126_v18 = vsel %vm74_vm2, 1.0, %v221_v9 }
  0x27   :  { %79 = vst [vmem:[#allocation7 + $0x4] sm:$0x3] %v126_v18  ;;  %v81_v19 = vsel %vm74_vm2, %v127_v17, %v73_v16 }
  0x28   :  { %v82_v20 = vadd.f32 %v140_v7, %v81_v19 }
  0x2a   :  { %vm83_vm3 = vcmp.gt.f32.partialorder %v82_v20, 1.0  ;;  %v129_v21 = vadd.f32 -1.0, %v82_v20 }
  0x2b   :  { %v128_v22 = vsel %vm83_vm3, 1.0, %v221_v9 }
  0x2c   :  { %88 = vst [vmem:[#allocation7 + $0x6] sm:$0x3] %v128_v22  ;;  %v90_v23 = vsel %vm83_vm3, %v129_v21, %v82_v20 }
  0x2d   :  { %v91_v24 = vadd.f32 %v140_v7, %v90_v23 }
  0x2f   :  { %vm92_vm4 = vcmp.gt.f32.partialorder %v91_v24, 1.0 }
  0x30   :  { %v130_v25 = vsel %vm92_vm4, 1.0, %v221_v9 }
  0x31   :  { %97 = vst [vmem:[#allocation7 + $0x8] sm:$0x3] %v130_v25 }
  0x32   :  { %110 = dma.vmem_to_hbm [thread:$0]  %s103_s2, 160, %s105_s25, [#allocation4], %s223_s26, %s223_s26, %s224_s27  }
  0x33   :  { %217 = dma.done.wait [#allocation4], 160  }
  0x34   :  { %218 = vsyncadd [#allocation4], 4294967136 }
  0x35   :  { %115 = vsyncpa [#allocation3], 1 }
  0x36   :  { %116 = vsyncpa [#allocation6], 1 }
  0x37   :  { %117 = vsyncpa [#allocation4], 1 }

</bundles_post_ra>
